<compile_context>
chip_gen: v5e
topology: v5e:2x2
jax: 0.10.0
libtpu: 0.0.40
codegen_flags: <defaults>
</compile_context>

<pallas_src>
import functools

import numpy as np
import jax
import jax.numpy as jnp
from jax.experimental import pallas as pl
from jax.experimental.pallas import tpu as pltpu


_VMEM_LIMIT = 32 * 1024 * 1024  # explicit scoped-VMEM budget (safe on v5e/v6e/v7x)


def _round_up(v, m):
    return ((v + m - 1) // m) * m


def _pad2(a, rows, cols):
    return jnp.pad(a, ((0, rows - a.shape[0]), (0, cols - a.shape[1])))


# --------------------------------------------------------------------------
# Projection kernel: proj = x @ W_packed + b_packed   (W_packed = [Wl | Wr])
# --------------------------------------------------------------------------
def _proj_kernel(x_ref, w_ref, b_ref, out_ref):
    out_ref[...] = (
        jnp.dot(x_ref[...], w_ref[...], preferred_element_type=jnp.float32)
        + b_ref[...])


def _projection(x, w_packed, b_packed, *, tm):
    """x: [Np, Fp] f32; w_packed: [Fp, 2*Dp] f32; b_packed: [1, 2*Dp] f32."""
    Np, Fp = x.shape
    Dp2 = w_packed.shape[1]
    return pl.pallas_call(
        _proj_kernel,
        out_shape=jax.ShapeDtypeStruct((Np, Dp2), jnp.float32),
        grid_spec=pltpu.PrefetchScalarGridSpec(
            num_scalar_prefetch=0,
            grid=(Np // tm,),
            in_specs=[
                pl.BlockSpec((tm, Fp), lambda i: (i, 0)),   # x rows
                pl.BlockSpec((Fp, Dp2), lambda i: (0, 0)),  # packed weight
                pl.BlockSpec((1, Dp2), lambda i: (0, 0)),   # packed bias
            ],
            out_specs=pl.BlockSpec((tm, Dp2), lambda i: (i, 0)),
        ),
        compiler_params=pltpu.CompilerParams(
            dimension_semantics=("parallel",),
            vmem_limit_bytes=_VMEM_LIMIT),
    )(x, w_packed, b_packed)


# --------------------------------------------------------------------------
# Aggregation kernel: out = A @ P + R, with ReLU / masked log_softmax epilogue
# --------------------------------------------------------------------------
def _agg_kernel(adj_ref, p_ref, r_ref, out_ref, *, activation, valid_cols):
    """adj_ref: (tm, tk) bf16; p_ref: (tk, Dp) bf16; r_ref/out_ref: (tm, Dp) f32."""
    k = pl.program_id(1)

    @pl.when(k == 0)
    def _init():
        out_ref[...] = r_ref[...]  # root branch + bias, computed in the projection

    # f32 accumulation directly into the resident output block.
    out_ref[...] += jnp.dot(adj_ref[...], p_ref[...],
                            preferred_element_type=jnp.float32)

    @pl.when(k == pl.num_programs(1) - 1)
    def _finalize():
        z = out_ref[...]
        if activation == "relu":
            out_ref[...] = jnp.maximum(z, 0.0)
        else:  # masked log_softmax over the (padded) class dimension
            col = jax.lax.broadcasted_iota(jnp.int32, z.shape, 1)
            zm = jnp.where(col < valid_cols, z, -jnp.inf)
            m = jnp.max(zm, axis=1, keepdims=True)
            s = jnp.sum(jnp.exp(zm - m), axis=1, keepdims=True)
            out_ref[...] = zm - m - jnp.log(s)


def _aggregate(adj, p, r, *, activation, valid_cols, tm, tk):
    """adj: [Np, Np] bf16; p: [Np, Dp] bf16; r: [Np, Dp] f32 -> [Np, Dp] f32."""
    Np = adj.shape[0]
    Dp = p.shape[1]
    kernel = functools.partial(_agg_kernel, activation=activation,
                               valid_cols=valid_cols)
    return pl.pallas_call(
        kernel,
        out_shape=jax.ShapeDtypeStruct((Np, Dp), jnp.float32),
        grid_spec=pltpu.PrefetchScalarGridSpec(
            num_scalar_prefetch=0,
            grid=(Np // tm, Np // tk),
            in_specs=[
                pl.BlockSpec((tm, tk), lambda i, k: (i, k)),   # adj tile (bf16)
                pl.BlockSpec((tk, Dp), lambda i, k: (k, 0)),   # P panel (bf16)
                pl.BlockSpec((tm, Dp), lambda i, k: (i, 0)),   # R rows (f32)
            ],
            out_specs=pl.BlockSpec((tm, Dp), lambda i, k: (i, 0)),
        ),
        compiler_params=pltpu.CompilerParams(
            dimension_semantics=("parallel", "arbitrary"),
            vmem_limit_bytes=_VMEM_LIMIT),
    )(adj, p, r)


# --------------------------------------------------------------------------
# Full forward pass
# --------------------------------------------------------------------------
def graphsage_forward(adj, x, wl1, wr1, b1, wl2, wr2, b2):
    """adj: [N,N]; x: [N,F]; wl1/wr1: [F,H]; b1: [1,H]; wl2/wr2: [H,C]; b2: [1,C]."""
    N, F_in = x.shape
    H = wl1.shape[1]
    C = wl2.shape[1]

    # Tile heuristic: grow the tile up to 1024 but keep >= 2 row tiles when the
    # graph is large enough (v7x has 2 TensorCores; single row tile idles one).
    n128 = _round_up(N, 128)
    tile = 128
    for t in (1024, 512, 256):
        if n128 >= 2 * t:
            tile = t
            break
    tm = tk = tile
    Np = _round_up(N, tile)
    Fp = _round_up(F_in, 128)
    Hp = _round_up(H, 128)
    Cp = _round_up(C, 128)

    # Dominant HBM stream (N^2 adjacency) in bf16; zero rows/cols contribute nothing.
    adj_p = _pad2(adj.astype(jnp.float32), Np, Np).astype(jnp.bfloat16)
    x_p = _pad2(x.astype(jnp.float32), Np, Fp)

    # Pack [Wl | Wr] (and [0 | b]) so the projection output width is 2*Dp >= 256.
    w1 = _pad2(jnp.concatenate(
        [_pad2(wl1.astype(jnp.float32), F_in, Hp),
         _pad2(wr1.astype(jnp.float32), F_in, Hp)], axis=1), Fp, 2 * Hp)
    b1p = jnp.concatenate(
        [jnp.zeros((1, Hp), jnp.float32), _pad2(b1.astype(jnp.float32), 1, Hp)], axis=1)
    w2 = _pad2(jnp.concatenate(
        [_pad2(wl2.astype(jnp.float32), H, Cp),
         _pad2(wr2.astype(jnp.float32), H, Cp)], axis=1), Hp, 2 * Cp)
    b2p = jnp.concatenate(
        [jnp.zeros((1, Cp), jnp.float32), _pad2(b2.astype(jnp.float32), 1, Cp)], axis=1)

    # ---- Layer 1: projection -> aggregation + ReLU ----
    proj1 = _projection(x_p, w1, b1p, tm=tm)
    p1 = proj1[:, :Hp].astype(jnp.bfloat16)   # neighbor branch operand (bf16 stream)
    r1 = proj1[:, Hp:]                        # root branch + bias (f32)
    a1 = _aggregate(adj_p, p1, r1, activation="relu", valid_cols=Hp, tm=tm, tk=tk)

    # F.dropout(..., training=False) is the identity at inference.
    # TODO(synk): training-mode dropout (stochastic mask) not implemented.

    # ---- Layer 2: projection -> aggregation + masked log_softmax ----
    proj2 = _projection(a1, w2, b2p, tm=tm)
    p2 = proj2[:, :Cp].astype(jnp.bfloat16)
    r2 = proj2[:, Cp:]
    out = _aggregate(adj_p, p2, r2, activation="log_softmax", valid_cols=C,
                     tm=tm, tk=tk)

    return out[:N, :C]


def _reference(adj, x, wl1, wr1, b1, wl2, wr2, b2):
    a1 = jnp.maximum(adj @ (x @ wl1) + x @ wr1 + b1, 0.0)
    z2 = adj @ (a1 @ wl2) + a1 @ wr2 + b2
    return jax.nn.log_softmax(z2, axis=1)


if __name__ == "__main__":
    # Small, self-consistent shapes: N nodes, F input features, H hidden, C classes.
    N, F, H, C = 64, 32, 32, 8
    num_edges = 256

    key = jax.random.PRNGKey(0)
    k_x, k_src, k_dst, k_wl1, k_wr1, k_wl2, k_wr2 = jax.random.split(key, 7)

    # Node features (data.x)
    x = jax.random.normal(k_x, (N, F), dtype=jnp.float32)

    # Random edge_index [2, E]; dense mean-aggregation matrix A (row-normalized),
    # i.e. PyG SAGEConv "mean" aggregation over in-neighbors.
    src = jax.random.randint(k_src, (num_edges,), 0, N)
    dst = jax.random.randint(k_dst, (num_edges,), 0, N)
    adj_bin = jnp.zeros((N, N), jnp.float32).at[dst, src].set(1.0)  # A[i,j]=1 if j->i
    deg = jnp.sum(adj_bin, axis=1, keepdims=True)
    adj = adj_bin / jnp.maximum(deg, 1.0)

    # Deterministic parameters (PyTorch Linear stores [out,in]; pre-transposed to [in,out]).
    wl1 = jax.random.normal(k_wl1, (F, H), dtype=jnp.float32) * (1.0 / np.sqrt(F))
    wr1 = jax.random.normal(k_wr1, (F, H), dtype=jnp.float32) * (1.0 / np.sqrt(F))
    b1 = jnp.zeros((1, H), dtype=jnp.float32)
    wl2 = jax.random.normal(k_wl2, (H, C), dtype=jnp.float32) * (1.0 / np.sqrt(H))
    wr2 = jax.random.normal(k_wr2, (H, C), dtype=jnp.float32) * (1.0 / np.sqrt(H))
    b2 = jnp.zeros((1, C), dtype=jnp.float32)

    out = graphsage_forward(adj, x, wl1, wr1, b1, wl2, wr2, b2)
    out = jax.block_until_ready(out)

    ref = _reference(adj, x, wl1, wr1, b1, wl2, wr2, b2)
    # Tolerance loosened vs f32 reference because the adjacency / P operands are
    # streamed in bf16 (accumulation stays f32).
    np.testing.assert_allclose(np.asarray(out), np.asarray(ref), rtol=5e-2, atol=5e-2)

    print("KERNEL_OK")
</pallas_src>

<mosaic_0001>
module attributes {stable_mosaic.version = 11 : i64} {
  func.func @_proj_kernel(%arg0: i32, %arg1: memref<128x128xf32, #tpu.memory_space<vmem>>, %arg2: memref<128x256xf32, #tpu.memory_space<vmem>>, %arg3: memref<1x256xf32, #tpu.memory_space<vmem>>, %arg4: memref<128x256xf32, #tpu.memory_space<vmem>>) attributes {dimension_semantics = [#tpu.dimension_semantics<parallel>], iteration_bounds = array<i64: 1>, scalar_prefetch = 0 : i64, scratch_operands = 0 : i64, tpu.core_type = #tpu.core_type<tc>, window_params = [{transform_indices = @transform_0, window_bounds = array<i64: 128, 128>}, {pipeline_mode = #tpu.pipeline_mode<synchronous>, transform_indices = @transform_1, window_bounds = array<i64: 128, 256>}, {pipeline_mode = #tpu.pipeline_mode<synchronous>, transform_indices = @transform_2, window_bounds = array<i64: 1, 256>}, {transform_indices = @transform_3, window_bounds = array<i64: 128, 256>}]} {
    %c0 = arith.constant 0 : index
    %c0_0 = arith.constant 0 : index
    %0 = vector.load %arg1[%c0, %c0_0] : memref<128x128xf32, #tpu.memory_space<vmem>>, vector<128x128xf32>
    %c0_1 = arith.constant 0 : index
    %c0_2 = arith.constant 0 : index
    %1 = vector.load %arg2[%c0_1, %c0_2] : memref<128x256xf32, #tpu.memory_space<vmem>>, vector<128x256xf32>
    %cst = arith.constant dense<0.000000e+00> : vector<128x256xf32>
    %2 = tpu.matmul %0, %1, %cst {dimension_numbers = #tpu.dot_dimension_numbers<[1], [0], [0], [1], [0, 0, 1, 1], [], []>} : vector<128x128xf32>, vector<128x256xf32>, vector<128x256xf32> -> vector<128x256xf32>
    %c0_3 = arith.constant 0 : index
    %c0_4 = arith.constant 0 : index
    %3 = vector.load %arg3[%c0_3, %c0_4] : memref<1x256xf32, #tpu.memory_space<vmem>>, vector<1x256xf32>
    %4 = vector.broadcast %3 : vector<1x256xf32> to vector<128x256xf32>
    %5 = arith.addf %2, %4 : vector<128x256xf32>
    %c0_5 = arith.constant 0 : index
    %c0_6 = arith.constant 0 : index
    %6 = vector.load %arg4[%c0_5, %c0_6] : memref<128x256xf32, #tpu.memory_space<vmem>>, vector<128x256xf32>
    tpu.vector_store %arg4[%c0_5, %c0_6], %5 {strides = array<i32>} : memref<128x256xf32, #tpu.memory_space<vmem>>, vector<128x256xf32>,
    return
  }
  func.func @transform_0(%arg0: i32) -> (i32, i32) {
    %c0_i32 = arith.constant 0 : i32
    %c0_i32_0 = arith.constant 0 : i32
    return %arg0, %c0_i32 : i32, i32
  }
  func.func @transform_1(%arg0: i32) -> (i32, i32) {
    %c0_i32 = arith.constant 0 : i32
    %c0_i32_0 = arith.constant 0 : i32
    %c0_i32_1 = arith.constant 0 : i32
    return %c0_i32, %c0_i32_0 : i32, i32
  }
  func.func @transform_2(%arg0: i32) -> (i32, i32) {
    %c0_i32 = arith.constant 0 : i32
    %c0_i32_0 = arith.constant 0 : i32
    %c0_i32_1 = arith.constant 0 : i32
    return %c0_i32, %c0_i32_0 : i32, i32
  }
  func.func @transform_3(%arg0: i32) -> (i32, i32) {
    %c0_i32 = arith.constant 0 : i32
    %c0_i32_0 = arith.constant 0 : i32
    return %arg0, %c0_i32 : i32, i32
  }
}

</mosaic_0001>

<bundles_post_ra>
// kernel: tpu_custom_call.1
= control target key start
LH: loop header
LB: loop body
LE: loop exit
PB: predicated region body
PF: predicated region fallthrough
CT: control target
= control target key end

     0   :  { %8 = vsyncpa [#allocation3], 0  ;;  %s520_s0 = inlined_call_operand.hbm [shape: f32[128,128], index: 0, kind: input, shape index: {}]   ;;  %s521_s1 = inlined_call_operand.hbm [shape: f32[128,256], index: 1, kind: input, shape index: {}]   ;;  %s522_s2 = inlined_call_operand.hbm [shape: f32[1,256], index: 2, kind: input, shape index: {}]   ;;  %s523_s3 = inlined_call_operand.hbm [shape: f32[128,256], index: 3, kind: output, shape index: {}]  }
   0x1   :  { %9 = vsyncpa [#allocation6], 0  ;;  %s28_s14 = sshll.u32 %s521_s1, 4  ;;  %s29_s14 = int_to_ptr.hbm [resolvable:$true] %s28_s14 }
   0x2   :  { %10 = vsyncpa [#allocation4], 0  ;;  %s438_s15 = smov [#allocation5]   ;;  %s15_s19 = sshll.u32 %s520_s0, 4  ;;  %s16_s19 = int_to_ptr.hbm [resolvable:$true] %s15_s19 }
   0x3   :  { %s30_s16 = sshll.u32 %s438_s15, 4  ;;  %s439_s20 = smov 256   ;;  %s31_s16 = int_to_ptr.vmem [resolvable:$true] %s30_s16 }
   0x4   :  { %s440_s21 = smov 16   ;;  %s441_s22 = smov [#allocation2]  }
   0x5   :  { %36 = dma.hbm_to_vmem [thread:$0]  %s29_s14, 4096, %s31_s16, [#allocation6], %s439_s20, %s439_s20, %s440_s21  }
   0x6   :  { %s17_s23 = sshll.u32 %s441_s22, 4  ;;  %s442_s1 = smov 128   ;;  %s18_s23 = int_to_ptr.vmem [resolvable:$true] %s17_s23 }
   0x7   :  { %s443_s24 = smov 8   ;;  %s42_s27 = sshll.u32 %s522_s2, 4  ;;  %s43_s27 = int_to_ptr.hbm [resolvable:$true] %s42_s27 }
   0x8   :  { %23 = dma.hbm_to_vmem [thread:$0]  %s16_s19, 2048, %s18_s23, [#allocation3], %s442_s1, %s442_s1, %s443_s24  }
   0x9   :  { %s444_s28 = smov [#allocation7]  }
   0xa   :  { %s44_s0 = sshll.u32 %s444_s28, 4  ;;  %s45_s0 = int_to_ptr.vmem [resolvable:$true] %s44_s0 }
   0xb   :  { %47 = dma.hbm_to_vmem [thread:$0]  %s43_s27, 32, %s45_s0, [#allocation6]  }
   0xc   :  { %432 = dma.done.wait [#allocation3], 2048  }
   0xd   :  { %433 = vsyncadd [#allocation3], 4294965248 }
   0xe   :  { %434 = dma.done.wait [#allocation6], 4128  }
   0xf   :  { %435 = vsyncadd [#allocation6], 4294963168  ;;  %v106_v0 = vld [vmem:[#allocation5 + $0xf0] sm:$0xff]  ;;  %v107_v1 = vld [vmem:[#allocation5 + $0xf8] sm:$0xff]  ;;  %s445_s2 = smov [#allocation8]   ;;  %s282_s5 = sshll.u32 %s523_s3, 4  ;;  %s283_s5 = int_to_ptr.hbm [resolvable:$true] %s282_s5 }
  0x10   :  { %v104_v2 = vld [vmem:[#allocation5 + $0xe0] sm:$0xff]  ;;  %296 = vmatpush.msra.mxu2 %v106_v0  ;;  %312 = vmatpush.msra.mxu3 %v107_v1  ;;  %v105_v3 = vld [vmem:[#allocation5 + $0xe8] sm:$0xff]  ;;  %v102_v4 = vld [vmem:[#allocation5 + $0xd0] sm:$0xff]  ;;  %s280_s29 = sshll.u32 %s445_s2, 4  ;;  %s281_s29 = int_to_ptr.vmem [resolvable:$true] %s280_s29 }
  0x11   :  { %v103_v5 = vld [vmem:[#allocation5 + $0xd8] sm:$0xff]  ;;  %114 = vmatpush.msra.mxu0 %v106_v0  ;;  %179 = vmatpush.msra.mxu1 %v107_v1  ;;  %v100_v6 = vld [vmem:[#allocation5 + $0xc0] sm:$0xff]  ;;  %v101_v7 = vld [vmem:[#allocation5 + $0xc8] sm:$0xff] }
  0x12   :  { %297 = vmatpush.msra.mxu2 %v104_v2  ;;  %313 = vmatpush.msra.mxu3 %v105_v3  ;;  %v98_v8 = vld [vmem:[#allocation5 + $0xb0] sm:$0xff]  ;;  %v99_v9 = vld [vmem:[#allocation5 + $0xb8] sm:$0xff]  ;;  %v96_v10 = vld [vmem:[#allocation5 + $0xa0] sm:$0xff] }
  0x13   :  { %115 = vmatpush.msra.mxu0 %v104_v2  ;;  %180 = vmatpush.msra.mxu1 %v105_v3  ;;  %v97_v11 = vld [vmem:[#allocation5 + $0xa8] sm:$0xff]  ;;  %v94_v12 = vld [vmem:[#allocation5 + $0x90] sm:$0xff]  ;;  %v95_v13 = vld [vmem:[#allocation5 + $0x98] sm:$0xff] }
  0x14   :  { %298 = vmatpush.msra.mxu2 %v102_v4  ;;  %314 = vmatpush.msra.mxu3 %v103_v5  ;;  %v92_v14 = vld [vmem:[#allocation5 + $0x80] sm:$0xff]  ;;  %v93_v15 = vld [vmem:[#allocation5 + $0x88] sm:$0xff]  ;;  %v90_v16 = vld [vmem:[#allocation5 + $0x70] sm:$0xff] }
  0x15   :  { %116 = vmatpush.msra.mxu0 %v102_v4  ;;  %181 = vmatpush.msra.mxu1 %v103_v5  ;;  %v91_v17 = vld [vmem:[#allocation5 + $0x78] sm:$0xff]  ;;  %v88_v18 = vld [vmem:[#allocation5 + $0x60] sm:$0xff]  ;;  %v89_v19 = vld [vmem:[#allocation5 + $0x68] sm:$0xff] }
  0x16   :  { %299 = vmatpush.msra.mxu2 %v100_v6  ;;  %315 = vmatpush.msra.mxu3 %v101_v7  ;;  %v86_v20 = vld [vmem:[#allocation5 + $0x50] sm:$0xff]  ;;  %v87_v21 = vld [vmem:[#allocation5 + $0x58] sm:$0xff]  ;;  %v84_v22 = vld [vmem:[#allocation5 + $0x40] sm:$0xff] }
  0x17   :  { %117 = vmatpush.msra.mxu0 %v100_v6  ;;  %182 = vmatpush.msra.mxu1 %v101_v7  ;;  %v85_v23 = vld [vmem:[#allocation5 + $0x48] sm:$0xff]  ;;  %v82_v24 = vld [vmem:[#allocation5 + $0x30] sm:$0xff]  ;;  %v83_v25 = vld [vmem:[#allocation5 + $0x38] sm:$0xff] }
  0x18   :  { %300 = vmatpush.msra.mxu2 %v98_v8  ;;  %316 = vmatpush.msra.mxu3 %v99_v9  ;;  %v80_v26 = vld [vmem:[#allocation5 + $0x20] sm:$0xff]  ;;  %v81_v27 = vld [vmem:[#allocation5 + $0x28] sm:$0xff]  ;;  %v78_v28 = vld [vmem:[#allocation5 + $0x10] sm:$0xff] }
  0x19   :  { %118 = vmatpush.msra.mxu0 %v98_v8  ;;  %183 = vmatpush.msra.mxu1 %v99_v9  ;;  %v79_v29 = vld [vmem:[#allocation5 + $0x18] sm:$0xff]  ;;  %v76_v30 = vld [vmem:[#allocation5] sm:$0xff]  ;;  %v77_v31 = vld [vmem:[#allocation5 + $0x8] sm:$0xff] }
  0x1a   :  { %301 = vmatpush.msra.mxu2 %v96_v10  ;;  %317 = vmatpush.msra.mxu3 %v97_v11  ;;  %v68_v32 = vld [vmem:[#allocation2 + $0x40] sm:$0xff]  ;;  %v69_v34 = vld [vmem:[#allocation2 + $0x48] sm:$0xff]  ;;  %v70_v36 = vld [vmem:[#allocation2 + $0x50] sm:$0xff] }
  0x1b   :  { %119 = vmatpush.msra.mxu0 %v96_v10  ;;  %184 = vmatpush.msra.mxu1 %v97_v11  ;;  %v60_v33 = vld [vmem:[#allocation2] sm:$0xff]  ;;  %v61_v35 = vld [vmem:[#allocation2 + $0x8] sm:$0xff]  ;;  %v62_v37 = vld [vmem:[#allocation2 + $0x10] sm:$0xff] }
  0x1c   :  { %302 = vmatpush.msra.mxu2 %v94_v12  ;;  %318 = vmatpush.msra.mxu3 %v95_v13  ;;  %v71_v38 = vld [vmem:[#allocation2 + $0x58] sm:$0xff]  ;;  %v72_v40 = vld [vmem:[#allocation2 + $0x60] sm:$0xff]  ;;  %v73_v42 = vld [vmem:[#allocation2 + $0x68] sm:$0xff] }
  0x1d   :  { %120 = vmatpush.msra.mxu0 %v94_v12  ;;  %185 = vmatpush.msra.mxu1 %v95_v13  ;;  %v63_v39 = vld [vmem:[#allocation2 + $0x18] sm:$0xff]  ;;  %v64_v41 = vld [vmem:[#allocation2 + $0x20] sm:$0xff]  ;;  %v65_v43 = vld [vmem:[#allocation2 + $0x28] sm:$0xff] }
  0x1e   :  { %303 = vmatpush.msra.mxu2 %v92_v14  ;;  %319 = vmatpush.msra.mxu3 %v93_v15  ;;  %v74_v44 = vld [vmem:[#allocation2 + $0x70] sm:$0xff]  ;;  %v75_v46 = vld [vmem:[#allocation2 + $0x78] sm:$0xff]  ;;  %v108_v48 = vld [vmem:[#allocation7] sm:$0x3] }
  0x1f   :  { %121 = vmatpush.msra.mxu0 %v92_v14  ;;  %186 = vmatpush.msra.mxu1 %v93_v15  ;;  %v66_v45 = vld [vmem:[#allocation2 + $0x30] sm:$0xff]  ;;  %v67_v47 = vld [vmem:[#allocation2 + $0x38] sm:$0xff]  ;;  %v478_v49 = vperm.slane %v108_v48, 0  ;;  %v480_v50 = vperm.slane %v108_v48, 1 }
  0x20   :  { %304 = vmatpush.msra.mxu2 %v90_v16  ;;  %320 = vmatpush.msra.mxu3 %v91_v17 }
  0x21   :  { %122 = vmatpush.msra.mxu0 %v90_v16  ;;  %187 = vmatpush.msra.mxu1 %v91_v17 }
  0x22   :  { %305 = vmatpush.msra.mxu2 %v88_v18  ;;  %321 = vmatpush.msra.mxu3 %v89_v19 }
  0x23   :  { %123 = vmatpush.msra.mxu0 %v88_v18  ;;  %188 = vmatpush.msra.mxu1 %v89_v19 }
  0x24   :  { %306 = vmatpush.msra.mxu2 %v86_v20  ;;  %322 = vmatpush.msra.mxu3 %v87_v21 }
  0x25   :  { %124 = vmatpush.msra.mxu0 %v86_v20  ;;  %189 = vmatpush.msra.mxu1 %v87_v21 }
  0x26   :  { %307 = vmatpush.msra.mxu2 %v84_v22  ;;  %323 = vmatpush.msra.mxu3 %v85_v23 }
  0x27   :  { %125 = vmatpush.msra.mxu0 %v84_v22  ;;  %190 = vmatpush.msra.mxu1 %v85_v23 }
  0x28   :  { %308 = vmatpush.msra.mxu2 %v82_v24  ;;  %324 = vmatpush.msra.mxu3 %v83_v25 }
  0x29   :  { %126 = vmatpush.msra.mxu0 %v82_v24  ;;  %191 = vmatpush.msra.mxu1 %v83_v25 }
  0x2a   :  { %309 = vmatpush.msra.mxu2 %v80_v26  ;;  %325 = vmatpush.msra.mxu3 %v81_v27 }
  0x2b   :  { %127 = vmatpush.msra.mxu0 %v80_v26  ;;  %192 = vmatpush.msra.mxu1 %v81_v27 }
  0x2c   :  { %310 = vmatpush.msra.mxu2 %v78_v28  ;;  %326 = vmatpush.msra.mxu3 %v79_v29 }
  0x2d   :  { %128 = vmatpush.msra.mxu0 %v78_v28  ;;  %193 = vmatpush.msra.mxu1 %v79_v29 }
  0x2e   :  { %311 = vmatpush.msra.mxu2 %v76_v30  ;;  %327 = vmatpush.msra.mxu3 %v77_v31 }
  0x2f   :  { %154 = vmatmul.f32.vlgmr.msra.gmra.mxu2 %v68_v32  ;;  %219 = vmatmul.f32.vlgmr.msra.gmra.mxu3 %v68_v32 }
  0x30   :  { %129 = vmatpush.msra.mxu0 %v76_v30  ;;  %194 = vmatpush.msra.mxu1 %v77_v31 }
  0x31   :  { %130 = vmatmul.f32.vlgmr.msra.gmra.mxu0 %v60_v33  ;;  %195 = vmatmul.f32.vlgmr.msra.gmra.mxu1 %v60_v33 }
  0x37   :  { %157 = vmatmul.f32.gmra.mxu2 %v69_v34  ;;  %222 = vmatmul.f32.gmra.mxu3 %v69_v34 }
  0x39   :  { %133 = vmatmul.f32.gmra.mxu0 %v61_v35  ;;  %198 = vmatmul.f32.gmra.mxu1 %v61_v35 }
  0x3f   :  { %160 = vmatmul.f32.gmra.mxu2 %v70_v36  ;;  %225 = vmatmul.f32.gmra.mxu3 %v70_v36 }
  0x41   :  { %136 = vmatmul.f32.gmra.mxu0 %v62_v37  ;;  %201 = vmatmul.f32.gmra.mxu1 %v62_v37 }
  0x47   :  { %163 = vmatmul.f32.gmra.mxu2 %v71_v38  ;;  %228 = vmatmul.f32.gmra.mxu3 %v71_v38 }
  0x49   :  { %139 = vmatmul.f32.gmra.mxu0 %v63_v39  ;;  %204 = vmatmul.f32.gmra.mxu1 %v63_v39 }
  0x4f   :  { %166 = vmatmul.f32.gmra.mxu2 %v72_v40  ;;  %231 = vmatmul.f32.gmra.mxu3 %v72_v40 }
  0x51   :  { %142 = vmatmul.f32.gmra.mxu0 %v64_v41  ;;  %207 = vmatmul.f32.gmra.mxu1 %v64_v41 }
  0x57   :  { %169 = vmatmul.f32.gmra.mxu2 %v73_v42  ;;  %234 = vmatmul.f32.gmra.mxu3 %v73_v42 }
  0x59   :  { %145 = vmatmul.f32.gmra.mxu0 %v65_v43  ;;  %210 = vmatmul.f32.gmra.mxu1 %v65_v43 }
  0x5f   :  { %172 = vmatmul.f32.gmra.mxu2 %v74_v44  ;;  %237 = vmatmul.f32.gmra.mxu3 %v74_v44 }
  0x61   :  { %148 = vmatmul.f32.gmra.mxu0 %v66_v45  ;;  %213 = vmatmul.f32.gmra.mxu1 %v66_v45 }
  0x67   :  { %175 = vmatmul.f32.gmra.mxu2 %v75_v46  ;;  %240 = vmatmul.f32.gmra.mxu3 %v75_v46 }
  0x69   :  { %151 = vmatmul.f32.gmra.mxu0 %v67_v47  ;;  %216 = vmatmul.f32.gmra.mxu1 %v67_v47 }
  0xae   :  { %v131_v51 = vpop.f32.mrf.mxu0  ;;  %v196_v52 = vpop.f32.mrf.mxu1 }
  0xaf   :  { %v132_v53 = vadd.f32 %v131_v51, %v478_v49  ;;  %v197_v54 = vadd.f32 %v196_v52, %v480_v50 }
  0xb1   :  { %244 = vst [vmem:[#allocation8] sm:$0xff] %v132_v53 }
  0xb2   :  { %v155_v55 = vpop.f32.mrf.mxu2  ;;  %245 = vst [vmem:[#allocation8 + $0x8] sm:$0xff] %v197_v54  ;;  %v220_v56 = vpop.f32.mrf.mxu3 }
  0xb3   :  { %v156_v57 = vadd.f32 %v155_v55, %v478_v49  ;;  %v221_v58 = vadd.f32 %v220_v56, %v480_v50 }
  0xb5   :  { %260 = vst [vmem:[#allocation8 + $0x80] sm:$0xff] %v156_v57 }
  0xb6   :  { %261 = vst [vmem:[#allocation8 + $0x88] sm:$0xff] %v221_v58  ;;  %v134_v59 = vpop.f32.mrf.mxu0  ;;  %v199_v60 = vpop.f32.mrf.mxu1 }
  0xb7   :  { %v135_v61 = vadd.f32 %v134_v59, %v478_v49  ;;  %v200_v62 = vadd.f32 %v199_v60, %v480_v50 }
  0xb9   :  { %246 = vst [vmem:[#allocation8 + $0x10] sm:$0xff] %v135_v61 }
  0xba   :  { %v158_v63 = vpop.f32.mrf.mxu2  ;;  %247 = vst [vmem:[#allocation8 + $0x18] sm:$0xff] %v200_v62  ;;  %v223_v0 = vpop.f32.mrf.mxu3 }
  0xbb   :  { %v159_v1 = vadd.f32 %v158_v63, %v478_v49  ;;  %v224_v2 = vadd.f32 %v223_v0, %v480_v50 }
  0xbd   :  { %262 = vst [vmem:[#allocation8 + $0x90] sm:$0xff] %v159_v1 }
  0xbe   :  { %263 = vst [vmem:[#allocation8 + $0x98] sm:$0xff] %v224_v2  ;;  %v137_v3 = vpop.f32.mrf.mxu0  ;;  %v202_v4 = vpop.f32.mrf.mxu1 }
  0xbf   :  { %v138_v5 = vadd.f32 %v137_v3, %v478_v49  ;;  %v203_v6 = vadd.f32 %v202_v4, %v480_v50 }
  0xc1   :  { %248 = vst [vmem:[#allocation8 + $0x20] sm:$0xff] %v138_v5 }
  0xc2   :  { %v161_v7 = vpop.f32.mrf.mxu2  ;;  %249 = vst [vmem:[#allocation8 + $0x28] sm:$0xff] %v203_v6  ;;  %v226_v8 = vpop.f32.mrf.mxu3 }
  0xc3   :  { %v162_v9 = vadd.f32 %v161_v7, %v478_v49  ;;  %v227_v10 = vadd.f32 %v226_v8, %v480_v50 }
  0xc5   :  { %264 = vst [vmem:[#allocation8 + $0xa0] sm:$0xff] %v162_v9 }
  0xc6   :  { %265 = vst [vmem:[#allocation8 + $0xa8] sm:$0xff] %v227_v10  ;;  %v140_v11 = vpop.f32.mrf.mxu0  ;;  %v205_v12 = vpop.f32.mrf.mxu1 }
  0xc7   :  { %v141_v13 = vadd.f32 %v140_v11, %v478_v49  ;;  %v206_v14 = vadd.f32 %v205_v12, %v480_v50 }
  0xc9   :  { %250 = vst [vmem:[#allocation8 + $0x30] sm:$0xff] %v141_v13 }
  0xca   :  { %v164_v15 = vpop.f32.mrf.mxu2  ;;  %251 = vst [vmem:[#allocation8 + $0x38] sm:$0xff] %v206_v14  ;;  %v229_v16 = vpop.f32.mrf.mxu3 }
  0xcb   :  { %v165_v17 = vadd.f32 %v164_v15, %v478_v49  ;;  %v230_v18 = vadd.f32 %v229_v16, %v480_v50 }
  0xcd   :  { %266 = vst [vmem:[#allocation8 + $0xb0] sm:$0xff] %v165_v17 }
  0xce   :  { %267 = vst [vmem:[#allocation8 + $0xb8] sm:$0xff] %v230_v18  ;;  %v143_v19 = vpop.f32.mrf.mxu0  ;;  %v208_v20 = vpop.f32.mrf.mxu1 }
  0xcf   :  { %v144_v21 = vadd.f32 %v143_v19, %v478_v49  ;;  %v209_v22 = vadd.f32 %v208_v20, %v480_v50 }
  0xd1   :  { %252 = vst [vmem:[#allocation8 + $0x40] sm:$0xff] %v144_v21 }
  0xd2   :  { %v167_v23 = vpop.f32.mrf.mxu2  ;;  %253 = vst [vmem:[#allocation8 + $0x48] sm:$0xff] %v209_v22  ;;  %v232_v24 = vpop.f32.mrf.mxu3 }
  0xd3   :  { %v168_v25 = vadd.f32 %v167_v23, %v478_v49  ;;  %v233_v26 = vadd.f32 %v232_v24, %v480_v50 }
  0xd5   :  { %268 = vst [vmem:[#allocation8 + $0xc0] sm:$0xff] %v168_v25 }
  0xd6   :  { %269 = vst [vmem:[#allocation8 + $0xc8] sm:$0xff] %v233_v26  ;;  %v146_v27 = vpop.f32.mrf.mxu0  ;;  %v211_v28 = vpop.f32.mrf.mxu1 }
  0xd7   :  { %v147_v29 = vadd.f32 %v146_v27, %v478_v49  ;;  %v212_v30 = vadd.f32 %v211_v28, %v480_v50 }
  0xd9   :  { %254 = vst [vmem:[#allocation8 + $0x50] sm:$0xff] %v147_v29 }
  0xda   :  { %v170_v31 = vpop.f32.mrf.mxu2  ;;  %255 = vst [vmem:[#allocation8 + $0x58] sm:$0xff] %v212_v30  ;;  %v235_v32 = vpop.f32.mrf.mxu3 }
  0xdb   :  { %v171_v33 = vadd.f32 %v170_v31, %v478_v49  ;;  %v236_v34 = vadd.f32 %v235_v32, %v480_v50 }
  0xdd   :  { %270 = vst [vmem:[#allocation8 + $0xd0] sm:$0xff] %v171_v33 }
  0xde   :  { %271 = vst [vmem:[#allocation8 + $0xd8] sm:$0xff] %v236_v34  ;;  %v149_v35 = vpop.f32.mrf.mxu0  ;;  %v214_v36 = vpop.f32.mrf.mxu1 }
  0xdf   :  { %v150_v37 = vadd.f32 %v149_v35, %v478_v49  ;;  %v215_v38 = vadd.f32 %v214_v36, %v480_v50 }
  0xe1   :  { %256 = vst [vmem:[#allocation8 + $0x60] sm:$0xff] %v150_v37 }
  0xe2   :  { %v173_v39 = vpop.f32.mrf.mxu2  ;;  %257 = vst [vmem:[#allocation8 + $0x68] sm:$0xff] %v215_v38  ;;  %v238_v40 = vpop.f32.mrf.mxu3 }
  0xe3   :  { %v174_v41 = vadd.f32 %v173_v39, %v478_v49  ;;  %v239_v42 = vadd.f32 %v238_v40, %v480_v50 }
  0xe5   :  { %272 = vst [vmem:[#allocation8 + $0xe0] sm:$0xff] %v174_v41 }
  0xe6   :  { %273 = vst [vmem:[#allocation8 + $0xe8] sm:$0xff] %v239_v42  ;;  %v152_v43 = vpop.f32.mrf.mxu0  ;;  %v217_v44 = vpop.f32.mrf.mxu1 }
  0xe7   :  { %v153_v45 = vadd.f32 %v152_v43, %v478_v49  ;;  %v218_v46 = vadd.f32 %v217_v44, %v480_v50 }
  0xe9   :  { %258 = vst [vmem:[#allocation8 + $0x70] sm:$0xff] %v153_v45 }
  0xea   :  { %v176_v47 = vpop.f32.mrf.mxu2  ;;  %259 = vst [vmem:[#allocation8 + $0x78] sm:$0xff] %v218_v46  ;;  %v241_v48 = vpop.f32.mrf.mxu3 }
  0xeb   :  { %v177_v51 = vadd.f32 %v176_v47, %v478_v49  ;;  %v242_v52 = vadd.f32 %v241_v48, %v480_v50 }
  0xed   :  { %274 = vst [vmem:[#allocation8 + $0xf0] sm:$0xff] %v177_v51 }
  0xee   :  { %275 = vst [vmem:[#allocation8 + $0xf8] sm:$0xff] %v242_v52 }
  0xef   :  { %288 = dma.vmem_to_hbm [thread:$0]  %s281_s29, 4096, %s283_s5, [#allocation4], %s439_s20, %s439_s20, %s440_s21  }
  0xf0   :  { %436 = dma.done.wait [#allocation4], 4096  }
  0xf1   :  { %437 = vsyncadd [#allocation4], 4294963200 }
  0xf2   :  { %293 = vsyncpa [#allocation3], 1 }
  0xf3   :  { %294 = vsyncpa [#allocation6], 1 }
  0xf4   :  { %295 = vsyncpa [#allocation4], 1 }

</bundles_post_ra>
